<compile_context>
chip_gen: v7x
topology: tpu7x:2x2x1
jax: 0.10.0
libtpu: 0.0.40
codegen_flags: <defaults>
</compile_context>

<pallas_src>
import functools

import jax
import jax.numpy as jnp
from jax.experimental import pallas as pl
from jax.experimental.pallas import tpu as pltpu

D_IN, D_HID, D_OUT = 1024, 512, 5
D_OUT_PAD = 128  # lane-dense output width (pad fc2 columns 5..127 with zeros)


def mlp_kernel(x_ref, w1_ref, b1_ref, w2_ref, b2_ref, o_ref):
    # fc1: bf16 x bf16 -> f32 accumulate on the MXU.
    h = jnp.dot(x_ref[...], w1_ref[...], preferred_element_type=jnp.float32)
    h = jnp.maximum(h + b1_ref[...], 0.0)          # (TILE_B, 512) + (1, 512), f32
    # Dropout(p=0.5) in eval/inference mode -> identity.
    # TODO(synk): training-mode dropout via pltpu.prng_seed + prng_random_bits.
    h = h.astype(jnp.bfloat16)                     # back to bf16 for the fc2 MXU pass
    y = jnp.dot(h, w2_ref[...], preferred_element_type=jnp.float32)
    o_ref[...] = (y + b2_ref[...]).astype(o_ref.dtype)   # (TILE_B, 128) lane-dense


def prepare_params(w1, b1, w2, b2):
    """One-time parameter prep (hoisted out of the forward call):
    bf16 weights, f32 2-D biases, fc2 zero-padded to a lane-dense 128-wide output."""
    w1_bf = w1.astype(jnp.bfloat16)
    b1_2d = b1.reshape(1, D_HID).astype(jnp.float32)
    w2_pad = (jnp.zeros((D_HID, D_OUT_PAD), jnp.float32)
              .at[:, :D_OUT].set(w2.astype(jnp.float32))).astype(jnp.bfloat16)
    b2_pad = jnp.zeros((1, D_OUT_PAD), jnp.float32).at[:, :D_OUT].set(b2)
    return w1_bf, b1_2d, w2_pad, b2_pad


def _round_up(n, m):
    return ((n + m - 1) // m) * m


@functools.partial(jax.jit, static_argnames=("tile_b",))
def mlp_forward(x, w1_bf, b1_2d, w2_pad, b2_pad, tile_b=512):
    B = x.shape[0]
    # Tile choice: 512-row tiles sit on the HBM-roofline knee.  When the whole
    # batch fits in one default tile, split it so the grid has >=2 steps (lets
    # the two v7x TensorCores both work); keep tb a multiple of 16 for the bf16
    # (16,128) sublane tile.
    if B > tile_b:
        tb = tile_b
    elif B > 16:
        tb = _round_up(pl.cdiv(B, 2), 16)
    else:
        tb = 16
    B_pad = _round_up(B, tb)

    x = x.astype(jnp.bfloat16)
    if B_pad != B:
        x = jnp.pad(x, ((0, B_pad - B), (0, 0)))
    grid = (B_pad // tb,)

    # Derived VMEM budget (bf16 operands, single-buffered weights), 2x headroom
    # for compiler scratch, with a safety floor well under every generation's limit.
    vmem_bytes = (
        2 * (2 * tb * D_IN)            # x double buffer (bf16)
        + 4 * (2 * tb * D_OUT_PAD)     # out double buffer (f32)
        + 2 * (D_IN * D_HID)           # w1 resident (bf16, single-buffered)
        + 2 * (D_HID * D_OUT_PAD)      # w2 resident (bf16, single-buffered)
        + 4 * (D_HID + D_OUT_PAD)      # biases (f32)
        + 4 * (tb * D_HID)             # hidden activation (f32)
        + 2 * (tb * D_HID)             # hidden activation (bf16 copy)
    )
    vmem_bytes = max(int(2 * vmem_bytes), 16 * 1024 * 1024)

    cost = pl.CostEstimate(
        flops=2 * B_pad * (D_IN * D_HID + D_HID * D_OUT_PAD),
        transcendentals=0,
        bytes_accessed=(
            2 * (B_pad * D_IN + D_IN * D_HID + D_HID * D_OUT_PAD)   # bf16 reads
            + 4 * (B_pad * D_OUT_PAD + D_HID + D_OUT_PAD)           # f32 out + biases
        ),
    )

    resident = dict(pipeline_mode=pl.Buffered(1))   # constant blocks: single buffer

    out = pl.pallas_call(
        mlp_kernel,
        out_shape=jax.ShapeDtypeStruct((B_pad, D_OUT_PAD), jnp.float32),
        grid_spec=pltpu.PrefetchScalarGridSpec(
            num_scalar_prefetch=0,
            grid=grid,
            in_specs=[
                pl.BlockSpec((tb, D_IN), lambda i: (i, 0)),                    # x tile
                pl.BlockSpec((D_IN, D_HID), lambda i: (0, 0), **resident),     # w1
                pl.BlockSpec((1, D_HID), lambda i: (0, 0), **resident),        # b1
                pl.BlockSpec((D_HID, D_OUT_PAD), lambda i: (0, 0), **resident),  # w2
                pl.BlockSpec((1, D_OUT_PAD), lambda i: (0, 0), **resident),    # b2
            ],
            out_specs=pl.BlockSpec((tb, D_OUT_PAD), lambda i: (i, 0)),
        ),
        compiler_params=pltpu.CompilerParams(
            dimension_semantics=("parallel",),   # megacore sharding on v7x
            vmem_limit_bytes=vmem_bytes,
        ),
        cost_estimate=cost,
    )(x, w1_bf, b1_2d, w2_pad, b2_pad)

    # Keep the module contract: (B, 5) output.  (Consumers that can read the
    # lane-padded slab directly should take `out[:B]` and columns 0..4 instead.)
    return out[:B, :D_OUT]


def init_params(key):
    # Mimic PyTorch nn.Linear default init: U(-1/sqrt(fan_in), 1/sqrt(fan_in)).
    k1, k2, k3, k4 = jax.random.split(key, 4)
    lim1 = 1.0 / jnp.sqrt(D_IN)
    lim2 = 1.0 / jnp.sqrt(D_HID)
    w1 = jax.random.uniform(k1, (D_IN, D_HID), jnp.float32, -lim1, lim1)
    b1 = jax.random.uniform(k2, (D_HID,), jnp.float32, -lim1, lim1)
    w2 = jax.random.uniform(k3, (D_HID, D_OUT), jnp.float32, -lim2, lim2)
    b2 = jax.random.uniform(k4, (D_OUT,), jnp.float32, -lim2, lim2)
    return w1, b1, w2, b2


if __name__ == "__main__":
    key = jax.random.PRNGKey(0)
    k_x, k_p = jax.random.split(key)
    w1, b1, w2, b2 = init_params(k_p)
    p_w1, p_b1, p_w2, p_b2 = prepare_params(w1, b1, w2, b2)

    def ref_f32(x):
        # Exact module semantics (f32).
        return jnp.maximum(x @ w1 + b1, 0.0) @ w2 + b2

    def ref_bf16(x):
        # Same mixed-precision recipe as the kernel (tight-tolerance reference).
        h = jnp.dot(x.astype(jnp.bfloat16), w1.astype(jnp.bfloat16),
                    preferred_element_type=jnp.float32) + b1
        h = jnp.maximum(h, 0.0).astype(jnp.bfloat16)
        return jnp.dot(h, w2.astype(jnp.bfloat16),
                       preferred_element_type=jnp.float32) + b2

    # Case 1: multi-step batch grid (B=64 -> tb=32, grid=(2,) with default tile_b).
    B1 = 64
    x1 = jax.random.normal(k_x, (B1, D_IN), jnp.float32)
    y1 = mlp_forward(x1, p_w1, p_b1, p_w2, p_b2)
    jax.block_until_ready(y1)
    assert y1.shape == (B1, D_OUT)
    assert jnp.allclose(y1, ref_bf16(x1), atol=1e-3, rtol=1e-3), "mismatch (bf16 ref)"
    assert jnp.allclose(y1, ref_f32(x1), atol=5e-2, rtol=5e-2), "mismatch (f32 ref)"

    # Case 2: ragged small batch -> pad-to-tile (multiple of 16) + slice path.
    B2 = 10
    x2 = jax.random.normal(jax.random.fold_in(k_x, 1), (B2, D_IN), jnp.float32)
    y2 = mlp_forward(x2, p_w1, p_b1, p_w2, p_b2)
    jax.block_until_ready(y2)
    assert y2.shape == (B2, D_OUT)
    assert jnp.allclose(y2, ref_bf16(x2), atol=1e-3, rtol=1e-3), "mismatch (bf16 ref, padded)"
    assert jnp.allclose(y2, ref_f32(x2), atol=5e-2, rtol=5e-2), "mismatch (f32 ref, padded)"

    print("KERNEL_OK")
</pallas_src>

<mosaic_0001>
module attributes {stable_mosaic.version = 11 : i64} {
  func.func @mlp_kernel(%arg0: i32, %arg1: memref<32x1024xbf16, #tpu.memory_space<vmem>>, %arg2: memref<1024x512xbf16, #tpu.memory_space<vmem>>, %arg3: memref<1x512xf32, #tpu.memory_space<vmem>>, %arg4: memref<512x128xbf16, #tpu.memory_space<vmem>>, %arg5: memref<1x128xf32, #tpu.memory_space<vmem>>, %arg6: memref<32x128xf32, #tpu.memory_space<vmem>>) attributes {dimension_semantics = [#tpu.dimension_semantics<parallel>], iteration_bounds = array<i64: 2>, scalar_prefetch = 0 : i64, scratch_operands = 0 : i64, tpu.core_type = #tpu.core_type<tc>, window_params = [{transform_indices = @transform_0, window_bounds = array<i64: 32, 1024>}, {pipeline_mode = #tpu.pipeline_mode<synchronous>, transform_indices = @transform_1, window_bounds = array<i64: 1024, 512>}, {pipeline_mode = #tpu.pipeline_mode<synchronous>, transform_indices = @transform_2, window_bounds = array<i64: 1, 512>}, {pipeline_mode = #tpu.pipeline_mode<synchronous>, transform_indices = @transform_3, window_bounds = array<i64: 512, 128>}, {pipeline_mode = #tpu.pipeline_mode<synchronous>, transform_indices = @transform_4, window_bounds = array<i64: 1, 128>}, {transform_indices = @transform_5, window_bounds = array<i64: 32, 128>}]} {
    %c0 = arith.constant 0 : index
    %c0_0 = arith.constant 0 : index
    %0 = vector.load %arg1[%c0, %c0_0] : memref<32x1024xbf16, #tpu.memory_space<vmem>>, vector<32x1024xbf16>
    %c0_1 = arith.constant 0 : index
    %c0_2 = arith.constant 0 : index
    %1 = vector.load %arg2[%c0_1, %c0_2] : memref<1024x512xbf16, #tpu.memory_space<vmem>>, vector<1024x512xbf16>
    %cst = arith.constant dense<0.000000e+00> : vector<32x512xf32>
    %2 = tpu.matmul %0, %1, %cst {dimension_numbers = #tpu.dot_dimension_numbers<[1], [0], [0], [1], [0, 0, 1, 1], [], []>} : vector<32x1024xbf16>, vector<1024x512xbf16>, vector<32x512xf32> -> vector<32x512xf32>
    %c0_3 = arith.constant 0 : index
    %c0_4 = arith.constant 0 : index
    %3 = vector.load %arg3[%c0_3, %c0_4] : memref<1x512xf32, #tpu.memory_space<vmem>>, vector<1x512xf32>
    %4 = vector.broadcast %3 : vector<1x512xf32> to vector<32x512xf32>
    %5 = arith.addf %2, %4 : vector<32x512xf32>
    %cst_5 = arith.constant 0.000000e+00 : f32
    %6 = vector.broadcast %cst_5 : f32 to vector<32x512xf32>
    %7 = arith.maximumf %5, %6 : vector<32x512xf32>
    %8 = arith.truncf %7 : vector<32x512xf32> to vector<32x512xbf16>
    %c0_6 = arith.constant 0 : index
    %c0_7 = arith.constant 0 : index
    %9 = vector.load %arg4[%c0_6, %c0_7] : memref<512x128xbf16, #tpu.memory_space<vmem>>, vector<512x128xbf16>
    %cst_8 = arith.constant dense<0.000000e+00> : vector<32x128xf32>
    %10 = tpu.matmul %8, %9, %cst_8 {dimension_numbers = #tpu.dot_dimension_numbers<[1], [0], [0], [1], [0, 0, 1, 1], [], []>} : vector<32x512xbf16>, vector<512x128xbf16>, vector<32x128xf32> -> vector<32x128xf32>
    %c0_9 = arith.constant 0 : index
    %c0_10 = arith.constant 0 : index
    %11 = vector.load %arg5[%c0_9, %c0_10] : memref<1x128xf32, #tpu.memory_space<vmem>>, vector<1x128xf32>
    %12 = vector.broadcast %11 : vector<1x128xf32> to vector<32x128xf32>
    %13 = arith.addf %10, %12 : vector<32x128xf32>
    %c0_11 = arith.constant 0 : index
    %c0_12 = arith.constant 0 : index
    %14 = vector.load %arg6[%c0_11, %c0_12] : memref<32x128xf32, #tpu.memory_space<vmem>>, vector<32x128xf32>
    tpu.vector_store %arg6[%c0_11, %c0_12], %13 {strides = array<i32>} : memref<32x128xf32, #tpu.memory_space<vmem>>, vector<32x128xf32>,
    return
  }
  func.func @transform_0(%arg0: i32) -> (i32, i32) {
    %c0_i32 = arith.constant 0 : i32
    %c0_i32_0 = arith.constant 0 : i32
    return %arg0, %c0_i32 : i32, i32
  }
  func.func @transform_1(%arg0: i32) -> (i32, i32) {
    %c0_i32 = arith.constant 0 : i32
    %c0_i32_0 = arith.constant 0 : i32
    %c0_i32_1 = arith.constant 0 : i32
    return %c0_i32, %c0_i32_0 : i32, i32
  }
  func.func @transform_2(%arg0: i32) -> (i32, i32) {
    %c0_i32 = arith.constant 0 : i32
    %c0_i32_0 = arith.constant 0 : i32
    %c0_i32_1 = arith.constant 0 : i32
    return %c0_i32, %c0_i32_0 : i32, i32
  }
  func.func @transform_3(%arg0: i32) -> (i32, i32) {
    %c0_i32 = arith.constant 0 : i32
    %c0_i32_0 = arith.constant 0 : i32
    %c0_i32_1 = arith.constant 0 : i32
    return %c0_i32, %c0_i32_0 : i32, i32
  }
  func.func @transform_4(%arg0: i32) -> (i32, i32) {
    %c0_i32 = arith.constant 0 : i32
    %c0_i32_0 = arith.constant 0 : i32
    %c0_i32_1 = arith.constant 0 : i32
    return %c0_i32, %c0_i32_0 : i32, i32
  }
  func.func @transform_5(%arg0: i32) -> (i32, i32) {
    %c0_i32 = arith.constant 0 : i32
    %c0_i32_0 = arith.constant 0 : i32
    return %arg0, %c0_i32 : i32, i32
  }
}

</mosaic_0001>

<bundles_post_ra>
// kernel: mlp_forward.1
= control target key start
LH: loop header
LB: loop body
LE: loop exit
PB: predicated region body
PF: predicated region fallthrough
CT: control target
= control target key end

     0   :  { %10 = vsyncpa [#allocation3], 0  ;;  %s3732_s18 = smov 0   ;;  %s3939_s0 = inlined_call_operand.vmem [shape: bf16[64,1024], index: 0, kind: input, shape index: {}]   ;;  %s3940_s1 = inlined_call_operand.hbm [shape: bf16[1024,512], index: 1, kind: input, shape index: {}]   ;;  %s3941_s2 = inlined_call_operand.vmem [shape: f32[1,512], index: 2, kind: input, shape index: {}]   ;;  %s3942_s3 = inlined_call_operand.vmem [shape: bf16[512,128], index: 3, kind: input, shape index: {}]   ;;  %s3943_s4 = inlined_call_operand.vmem [shape: f32[1,128], index: 4, kind: input, shape index: {}]   ;;  %s3944_s5 = inlined_call_operand.vmem [shape: f32[64,128], index: 5, kind: output, shape index: {}]  }
   0x1 LB: > { %s2782_s19 = sadd.s32 4294967295, %s3697_s18   ;;  %p2784_p0 = scmp.ge.s32.totalorder %s3697_s18, 1  ;;  %s3697_s18 = sphi %s3732_s18, %s16_s18  }
   0x2   : > { %p157_p1 = scmp.lt.s32.totalorder %s3697_s18, 3  ;;  %s3699_s20 = smov [#allocation2]  }
   0x3   : > { %s169_s21 = sshll.u32 %s3699_s20, 4  ;;  %p3746_p3 = scmp.eq.s32.totalorder %s2782_s19, 0  ;;  %s170_s21 = int_to_ptr.vmem [resolvable:$true] %s169_s21 }
   0x4   : > { %p3740_p2 = pnand %p2784_p0, %p157_p1  ;;  %s3659_s27 = scalar_lea.hbm %s3940_s1, 32768 }
   0x5   : > { %s3949_s23 = scalar_select %p3746_p3, 1, 0 }
   0x6   : > { %s3948_s22 = scalar_select %p3740_p2, 1, 0 }
   0x7   : > { %p3226_p4 = pneg %p3740_p2  ;;  %p3660_p6 = scmp.ne.s32.totalorder %s3940_s1, %s3659_s27 }
   0x8   : > { %p3666_p10 = scmp.lt.u32.totalorder %s3659_s27, %s3940_s1 }
   0x9   : > { %p3754_p5 = pnand %p3746_p3, %p3226_p4 }
   0xb   : > { %p3661_p7 = pneg %p3754_p5 }
   0xd   : > { %p3662_p8 = pnand %p3661_p7, %p3660_p6 }
   0xf   : > { %p3663_p9 = pneg %p3662_p8 }
  0x11   : > { %p3668_p11 = pnand %p3666_p10, %p3663_p9 }
  0x13   : > { %3671 = shalt.err (!%p3668_p11)
}
  0x14   : > { %s3672_s7 = scalar_lea.vmem %s170_s21, 32768  ;;  %p3680_p1 = scmp.lt.s32.totalorder %s170_s21, %s170_s21 }
  0x15   : > { %p3673_p12 = scmp.ne.s32.totalorder %s170_s21, %s3672_s7  ;;  %p3681_p4 = scmp.lt.s32.totalorder %s3672_s7, %s3672_s7 }
  0x17   : > { %p3675_p13 = pnand %p3673_p12, %p3661_p7  ;;  %p3682_p3 = por %p3681_p4, %p3680_p1 }
  0x19   : > { %p3676_p0 = pneg %p3675_p13 }
  0x1b   : > { %p3683_p2 = pnand %p3682_p3, %p3676_p0 }
  0x1d   : > { %3686 = shalt.err (!%p3683_p2)
}
  0x1e   : > { %s3700_s8 = smov 256   ;;  %s3701_s9 = smov 16  }
  0x1f   : > { %3229 = dma.hbm_to_vmem [thread:$0]  (!%p3754_p5), %s3940_s1, 32768, %s170_s21, [#allocation3], %s3700_s8, %s3700_s8, %s3701_s9  }
  0x20   : > { %p3951_p6 = scmp.ne.s32.totalorder %s3948_s22, 0 }
  0x21   : > { %p3952_p8 = scmp.ne.s32.totalorder (!%p3951_p6), %s3949_s23, 0 }
  0x22   : > { %204 = sbr.rel (%p3951_p6) target bundleno = 751 (0x2ef), region = 40 }
  0x29   : > { %3692 = dma.done.wait (%p3952_p8), [#allocation3], 32768  }
  0x2a   : > { %3694 = vsyncadd (%p3952_p8), [#allocation3], 4294934528  ;;  %v3243_v0 = vld [vmem:[#allocation2 + $0x4] ss:$16 sps:$4 sm:$0xff]   ;;  %v3245_v1 = vld [vmem:[#allocation2 + $0xc] ss:$16 sps:$4 sm:$0xff]  }
  0x2b   : > { %1901 = vmatprep.subr.bf16.mxu0 %v3243_v0  ;;  %v3247_v2 = vld [vmem:[#allocation2] ss:$16 sps:$4 sm:$0xff]   ;;  %v3248_v3 = vld [vmem:[#allocation2 + $0x8] ss:$16 sps:$4 sm:$0xff]   ;;  %2113 = vmatprep.subr.bf16.mxu1 %v3245_v1  ;;  %v3249_v4 = vld [vmem:[#allocation2 + $0x24] ss:$16 sps:$4 sm:$0xff]  }
  0x2c   : > { %1902 = vmatpush1.bf16.msra.mxu0 %v3247_v2  ;;  %2114 = vmatpush1.bf16.msra.mxu1 %v3248_v3  ;;  %v3251_v5 = vld [vmem:[#allocation2 + $0x2c] ss:$16 sps:$4 sm:$0xff]   ;;  %v3253_v6 = vld [vmem:[#allocation2 + $0x20] ss:$16 sps:$4 sm:$0xff]   ;;  %v3254_v7 = vld [vmem:[#allocation2 + $0x28] ss:$16 sps:$4 sm:$0xff]  }
  0x2d   : > { %1903 = vmatprep.subr.bf16.mxu0 %v3249_v4  ;;  %2115 = vmatprep.subr.bf16.mxu1 %v3251_v5  ;;  %v3255_v8 = vld [vmem:[#allocation2 + $0x44] ss:$16 sps:$4 sm:$0xff]   ;;  %v3257_v9 = vld [vmem:[#allocation2 + $0x4c] ss:$16 sps:$4 sm:$0xff]   ;;  %v3259_v10 = vld [vmem:[#allocation2 + $0x40] ss:$16 sps:$4 sm:$0xff]  }
  0x2e   : > { %v3260_v11 = vld [vmem:[#allocation2 + $0x48] ss:$16 sps:$4 sm:$0xff]   ;;  %v3261_v12 = vld [vmem:[#allocation2 + $0x64] ss:$16 sps:$4 sm:$0xff]   ;;  %v3263_v13 = vld [vmem:[#allocation2 + $0x6c] ss:$16 sps:$4 sm:$0xff]  }
  0x2f   : > { %v3265_v14 = vld [vmem:[#allocation2 + $0x60] ss:$16 sps:$4 sm:$0xff]   ;;  %v3266_v15 = vld [vmem:[#allocation2 + $0x68] ss:$16 sps:$4 sm:$0xff]   ;;  %v3267_v16 = vld [vmem:[#allocation2 + $0x84] ss:$16 sps:$4 sm:$0xff]  }
  0x30   : > { %1904 = vmatpush1.bf16.msra.mxu0 %v3253_v6  ;;  %2116 = vmatpush1.bf16.msra.mxu1 %v3254_v7  ;;  %v3269_v17 = vld [vmem:[#allocation2 + $0x8c] ss:$16 sps:$4 sm:$0xff]   ;;  %v3271_v18 = vld [vmem:[#allocation2 + $0x80] ss:$16 sps:$4 sm:$0xff]   ;;  %v3272_v19 = vld [vmem:[#allocation2 + $0x88] ss:$16 sps:$4 sm:$0xff]  }
  0x31   : > { %1905 = vmatprep.subr.bf16.mxu0 %v3255_v8  ;;  %2117 = vmatprep.subr.bf16.mxu1 %v3257_v9  ;;  %v3273_v20 = vld [vmem:[#allocation2 + $0xa4] ss:$16 sps:$4 sm:$0xff]   ;;  %v3275_v21 = vld [vmem:[#allocation2 + $0xac] ss:$16 sps:$4 sm:$0xff]   ;;  %v3277_v22 = vld [vmem:[#allocation2 + $0xa0] ss:$16 sps:$4 sm:$0xff]  }
  0x32   : > { %v3278_v23 = vld [vmem:[#allocation2 + $0xa8] ss:$16 sps:$4 sm:$0xff]   ;;  %v3279_v24 = vld [vmem:[#allocation2 + $0xc4] ss:$16 sps:$4 sm:$0xff]   ;;  %v3281_v25 = vld [vmem:[#allocation2 + $0xcc] ss:$16 sps:$4 sm:$0xff]  }
  0x33   : > { %v3283_v26 = vld [vmem:[#allocation2 + $0xc0] ss:$16 sps:$4 sm:$0xff]   ;;  %v3284_v27 = vld [vmem:[#allocation2 + $0xc8] ss:$16 sps:$4 sm:$0xff]   ;;  %v3285_v28 = vld [vmem:[#allocation2 + $0xe4] ss:$16 sps:$4 sm:$0xff]  }
  0x34   : > { %1906 = vmatpush1.bf16.msra.mxu0 %v3259_v10  ;;  %2118 = vmatpush1.bf16.msra.mxu1 %v3260_v11  ;;  %v3287_v29 = vld [vmem:[#allocation2 + $0xec] ss:$16 sps:$4 sm:$0xff]   ;;  %s2789_s12 = sshll.u32 %s2782_s19, 2  ;;  %v3289_v30 = vld [vmem:[#allocation2 + $0xe0] ss:$16 sps:$4 sm:$0xff]  }
  0x35   : > { %1907 = vmatprep.subr.bf16.mxu0 %v3261_v12  ;;  %2119 = vmatprep.subr.bf16.mxu1 %v3263_v13  ;;  %v3290_v31 = vld [vmem:[#allocation2 + $0xe8] ss:$16 sps:$4 sm:$0xff]   ;;  %v3291_v32 = vld [vmem:[#allocation2 + $0x104] ss:$16 sps:$4 sm:$0xff]   ;;  %p234_p2 = scmp.lt.s32.totalorder %s2789_s12, 7 }
  0x36   : > { %v3293_v33 = vld [vmem:[#allocation2 + $0x10c] ss:$16 sps:$4 sm:$0xff]   ;;  %v3295_v34 = vld [vmem:[#allocation2 + $0x100] ss:$16 sps:$4 sm:$0xff]   ;;  %v3296_v35 = vld [vmem:[#allocation2 + $0x108] ss:$16 sps:$4 sm:$0xff]  }
  0x37   : > { %v3297_v36 = vld [vmem:[#allocation2 + $0x124] ss:$16 sps:$4 sm:$0xff]   ;;  %s3954_s12 = smov (!%p234_p2, %s2789_s12), 7  ;;  %v3299_v37 = vld [vmem:[#allocation2 + $0x12c] ss:$16 sps:$4 sm:$0xff]  }
  0x38   : > { %1908 = vmatpush1.bf16.msra.mxu0 %v3265_v14  ;;  %2120 = vmatpush1.bf16.msra.mxu1 %v3266_v15  ;;  %v3301_v38 = vld [vmem:[#allocation2 + $0x120] ss:$16 sps:$4 sm:$0xff]   ;;  %v3302_v39 = vld [vmem:[#allocation2 + $0x128] ss:$16 sps:$4 sm:$0xff]   ;;  %v3303_v40 = vld [vmem:[#allocation2 + $0x144] ss:$16 sps:$4 sm:$0xff]  }
  0x39   : > { %1909 = vmatprep.subr.bf16.mxu0 %v3267_v16  ;;  %2121 = vmatprep.subr.bf16.mxu1 %v3269_v17  ;;  %s3101_s13 = sshll.u32 %s3954_s12, 5  ;;  %v3305_v41 = vld [vmem:[#allocation2 + $0x14c] ss:$16 sps:$4 sm:$0xff]   ;;  %v3307_v42 = vld [vmem:[#allocation2 + $0x140] ss:$16 sps:$4 sm:$0xff]  }
  0x3a   : > { %v3308_v43 = vld [vmem:[#allocation2 + $0x148] ss:$16 sps:$4 sm:$0xff]   ;;  %s3788_s16 = scalar_lea.vmem %s3939_s0, %s3101_s13  ;;  %v3309_v44 = vld [vmem:[#allocation2 + $0x164] ss:$16 sps:$4 sm:$0xff]   ;;  %v3311_v45 = vld [vmem:[#allocation2 + $0x16c] ss:$16 sps:$4 sm:$0xff]  }
  0x3b   : > { %v247_v46 = vld [vmem:[%s3788_s16] sm:$0xff]  ;;  %v3314_v49 = vld [vmem:[#allocation2 + $0x168] ss:$16 sps:$4 sm:$0xff]   ;;  %v3317_v52 = vld [vmem:[#allocation2 + $0x18c] ss:$16 sps:$4 sm:$0xff]  }
  0x3c   : > { %1910 = vmatpush1.bf16.msra.mxu0 %v3271_v18  ;;  %2122 = vmatpush1.bf16.msra.mxu1 %v3272_v19  ;;  %v251_v47 = vld [vmem:[%s3788_s16 + $0x20] sm:$0xff]  ;;  %v3320_v54 = vld [vmem:[#allocation2 + $0x188] ss:$16 sps:$4 sm:$0xff]   ;;  %v3323_v56 = vld [vmem:[#allocation2 + $0x1ac] ss:$16 sps:$4 sm:$0xff]  }
  0x3d   : > { %1911 = vmatprep.subr.bf16.mxu0 %v3273_v20  ;;  %2123 = vmatprep.subr.bf16.mxu1 %v3275_v21  ;;  %v3313_v48 = vld [vmem:[#allocation2 + $0x160] ss:$16 sps:$4 sm:$0xff]   ;;  %v2795_v50 = vcombine.high %v247_v46, %v251_v47  ;;  %v3315_v51 = vld [vmem:[#allocation2 + $0x184] ss:$16 sps:$4 sm:$0xff]   ;;  %v3326_v58 = vld [vmem:[#allocation2 + $0x1a8] ss:$16 sps:$4 sm:$0xff]   ;;  %v2794_v5 = vcombine.low %v247_v46, %v251_v47 }
  0x3e   : > { %v3319_v53 = vld [vmem:[#allocation2 + $0x180] ss:$16 sps:$4 sm:$0xff]   ;;  %v3321_v55 = vld [vmem:[#allocation2 + $0x1a4] ss:$16 sps:$4 sm:$0xff]   ;;  %v3329_v60 = vld [vmem:[#allocation2 + $0x1cc] ss:$16 sps:$4 sm:$0xff]  }
  0x3f   : > { %1933 = vmatprep.mubr.bf16.mxu0 %v2795_v50  ;;  %2145 = vmatprep.mubr.bf16.mxu1 %v2795_v50  ;;  %v3325_v57 = vld [vmem:[#allocation2 + $0x1a0] ss:$16 sps:$4 sm:$0xff]   ;;  %v3327_v59 = vld [vmem:[#allocation2 + $0x1c4] ss:$16 sps:$4 sm:$0xff]   ;;  %v3332_v62 = vld [vmem:[#allocation2 + $0x1c8] ss:$16 sps:$4 sm:$0xff]  }
  0x40   : > { %1912 = vmatpush1.bf16.msra.mxu0 %v3277_v22  ;;  %2124 = vmatpush1.bf16.msra.mxu1 %v3278_v23  ;;  %v3331_v61 = vld [vmem:[#allocation2 + $0x1c0] ss:$16 sps:$4 sm:$0xff]   ;;  %v3333_v63 = vld [vmem:[#allocation2 + $0x1e4] ss:$16 sps:$4 sm:$0xff]   ;;  %v3335_v0 = vld [vmem:[#allocation2 + $0x1ec] ss:$16 sps:$4 sm:$0xff]  }
  0x41   : > { %1913 = vmatprep.subr.bf16.mxu0 %v3279_v24  ;;  %2125 = vmatprep.subr.bf16.mxu1 %v3281_v25  ;;  %v3337_v1 = vld [vmem:[#allocation2 + $0x1e0] ss:$16 sps:$4 sm:$0xff]   ;;  %v3338_v2 = vld [vmem:[#allocation2 + $0x1e8] ss:$16 sps:$4 sm:$0xff]   ;;  %v3341_v3 = vld [vmem:[#allocation2 + $0x204] ss:$16 sps:$4 sm:$0xff]  }
  0x42   : > { %v3344_v4 = vld [vmem:[#allocation2 + $0x20c] ss:$16 sps:$4 sm:$0xff]   ;;  %v3339_v6 = vld [vmem:[#allocation2 + $0x200] ss:$16 sps:$4 sm:$0xff]   ;;  %v3342_v7 = vld [vmem:[#allocation2 + $0x208] ss:$16 sps:$4 sm:$0xff]  }
  0x43   : > { %v3347_v8 = vld [vmem:[#allocation2 + $0x224] ss:$16 sps:$4 sm:$0xff]   ;;  %v3350_v9 = vld [vmem:[#allocation2 + $0x22c] ss:$16 sps:$4 sm:$0xff]   ;;  %v3345_v10 = vld [vmem:[#allocation2 + $0x220] ss:$16 sps:$4 sm:$0xff]  }
  0x44   : > { %1914 = vmatpush1.bf16.msra.mxu0 %v3283_v26  ;;  %2126 = vmatpush1.bf16.msra.mxu1 %v3284_v27  ;;  %v3348_v11 = vld [vmem:[#allocation2 + $0x228] ss:$16 sps:$4 sm:$0xff]   ;;  %v3353_v12 = vld [vmem:[#allocation2 + $0x244] ss:$16 sps:$4 sm:$0xff]   ;;  %v3356_v13 = vld [vmem:[#allocation2 + $0x24c] ss:$16 sps:$4 sm:$0xff]  }
  0x45   : > { %1915 = vmatprep.subr.bf16.mxu0 %v3285_v28  ;;  %2127 = vmatprep.subr.bf16.mxu1 %v3287_v29  ;;  %v3351_v14 = vld [vmem:[#allocation2 + $0x240] ss:$16 sps:$4 sm:$0xff]   ;;  %v3354_v15 = vld [vmem:[#allocation2 + $0x248] ss:$16 sps:$4 sm:$0xff]   ;;  %v3359_v16 = vld [vmem:[#allocation2 + $0x264] ss:$16 sps:$4 sm:$0xff]  }
  0x46   : > { %v3362_v17 = vld [vmem:[#allocation2 + $0x26c] ss:$16 sps:$4 sm:$0xff]   ;;  %v3357_v18 = vld [vmem:[#allocation2 + $0x260] ss:$16 sps:$4 sm:$0xff]   ;;  %v3360_v19 = vld [vmem:[#allocation2 + $0x268] ss:$16 sps:$4 sm:$0xff]  }
  0x47   : > { %v3365_v20 = vld [vmem:[#allocation2 + $0x284] ss:$16 sps:$4 sm:$0xff]   ;;  %v3368_v21 = vld [vmem:[#allocation2 + $0x28c] ss:$16 sps:$4 sm:$0xff]   ;;  %v3363_v22 = vld [vmem:[#allocation2 + $0x280] ss:$16 sps:$4 sm:$0xff]  }
  0x48   : > { %1916 = vmatpush1.bf16.msra.mxu0 %v3289_v30  ;;  %2128 = vmatpush1.bf16.msra.mxu1 %v3290_v31  ;;  %v3366_v23 = vld [vmem:[#allocation2 + $0x288] ss:$16 sps:$4 sm:$0xff]   ;;  %v3371_v24 = vld [vmem:[#allocation2 + $0x2a4] ss:$16 sps:$4 sm:$0xff]   ;;  %v3374_v25 = vld [vmem:[#allocation2 + $0x2ac] ss:$16 sps:$4 sm:$0xff]  }
  0x49   : > { %1917 = vmatprep.subr.bf16.mxu0 %v3291_v32  ;;  %2129 = vmatprep.subr.bf16.mxu1 %v3293_v33  ;;  %v255_v26 = vld [vmem:[%s3788_s16 + $0x40] sm:$0xff]  ;;  %v3372_v30 = vld [vmem:[#allocation2 + $0x2a8] ss:$16 sps:$4 sm:$0xff]   ;;  %v3380_v33 = vld [vmem:[#allocation2 + $0x2cc] ss:$16 sps:$4 sm:$0xff]  }
  0x4a   : > { %v259_v27 = vld [vmem:[%s3788_s16 + $0x60] sm:$0xff]  ;;  %v3390_v46 = vld [vmem:[#allocation2 + $0x308] ss:$16 sps:$4 sm:$0xff]  }
  0x4b   : > { %v2803_v28 = vcombine.high %v255_v26, %v259_v27  ;;  %v3369_v29 = vld [vmem:[#allocation2 + $0x2a0] ss:$16 sps:$4 sm:$0xff]   ;;  %v2802_v31 = vcombine.low %v255_v26, %v259_v27  ;;  %v3377_v32 = vld [vmem:[#allocation2 + $0x2c4] ss:$16 sps:$4 sm:$0xff]   ;;  %v3396_v50 = vld [vmem:[#allocation2 + $0x328] ss:$16 sps:$4 sm:$0xff]  }
  0x4c   : > { %1918 = vmatpush1.bf16.msra.mxu0 %v3295_v34  ;;  %2130 = vmatpush1.bf16.msra.mxu1 %v3296_v35  ;;  %v3795_v34 = vld [vmem:[%s3788_s16 + $0x8] sm:$0xff]  ;;  %v3395_v47 = vld [vmem:[#allocation2 + $0x324] ss:$16 sps:$4 sm:$0xff]  }
  0x4d   : > { %1919 = vmatprep.subr.bf16.mxu0 %v3297_v36  ;;  %2131 = vmatprep.subr.bf16.mxu1 %v3299_v37  ;;  %v3798_v35 = vld [vmem:[%s3788_s16 + $0x28] sm:$0xff]  ;;  %v3375_v36 = vld [vmem:[#allocation2 + $0x2c0] ss:$16 sps:$4 sm:$0xff]  }
  0x4e   : > { %v3378_v37 = vld [vmem:[#allocation2 + $0x2c8] ss:$16 sps:$4 sm:$0xff]   ;;  %v3810_v27 = vld [vmem:[%s3788_s16 + $0x30] sm:$0xff] }
  0x50   : > { %1920 = vmatpush1.bf16.msra.mxu0 %v3301_v38  ;;  %2132 = vmatpush1.bf16.msra.mxu1 %v3302_v39  ;;  %v2797_v38 = vcombine.high %v3795_v34, %v3798_v35  ;;  %v3383_v39 = vld [vmem:[#allocation2 + $0x2e4] ss:$16 sps:$4 sm:$0xff]  }
  0x51   : > { %1921 = vmatprep.subr.bf16.mxu0 %v3303_v40  ;;  %2133 = vmatprep.subr.bf16.mxu1 %v3305_v41  ;;  %v3386_v40 = vld [vmem:[#allocation2 + $0x2ec] ss:$16 sps:$4 sm:$0xff]   ;;  %v3381_v41 = vld [vmem:[#allocation2 + $0x2e0] ss:$16 sps:$4 sm:$0xff]  }
  0x54   : > { %1922 = vmatpush1.bf16.msra.mxu0 %v3307_v42  ;;  %2134 = vmatpush1.bf16.msra.mxu1 %v3308_v43  ;;  %v3384_v42 = vld [vmem:[#allocation2 + $0x2e8] ss:$16 sps:$4 sm:$0xff]   ;;  %v3389_v43 = vld [vmem:[#allocation2 + $0x304] ss:$16 sps:$4 sm:$0xff]  }
  0x55   : > { %1923 = vmatprep.subr.bf16.mxu0 %v3309_v44  ;;  %2135 = vmatprep.subr.bf16.mxu1 %v3311_v45  ;;  %v3392_v44 = vld [vmem:[#allocation2 + $0x30c] ss:$16 sps:$4 sm:$0xff]   ;;  %v3387_v45 = vld [vmem:[#allocation2 + $0x300] ss:$16 sps:$4 sm:$0xff]  }
  0x58   : > { %1924 = vmatpush1.bf16.msra.mxu0 %v3313_v48  ;;  %2136 = vmatpush1.bf16.msra.mxu1 %v3314_v49  ;;  %v3398_v48 = vld [vmem:[#allocation2 + $0x32c] ss:$16 sps:$4 sm:$0xff]   ;;  %v3393_v49 = vld [vmem:[#allocation2 + $0x320] ss:$16 sps:$4 sm:$0xff]  }
  0x59   : > { %1925 = vmatprep.subr.bf16.mxu0 %v3315_v51  ;;  %2137 = vmatprep.subr.bf16.mxu1 %v3317_v52  ;;  %v3401_v51 = vld [vmem:[#allocation2 + $0x344] ss:$16 sps:$4 sm:$0xff]   ;;  %v3404_v52 = vld [vmem:[#allocation2 + $0x34c] ss:$16 sps:$4 sm:$0xff]  }
  0x5c   : > { %1926 = vmatpush1.bf16.msra.mxu0 %v3319_v53  ;;  %2138 = vmatpush1.bf16.msra.mxu1 %v3320_v54  ;;  %v3399_v53 = vld [vmem:[#allocation2 + $0x340] ss:$16 sps:$4 sm:$0xff]   ;;  %v3402_v54 = vld [vmem:[#allocation2 + $0x348] ss:$16 sps:$4 sm:$0xff]  }
  0x5d   : > { %1927 = vmatprep.subr.bf16.mxu0 %v3321_v55  ;;  %2139 = vmatprep.subr.bf16.mxu1 %v3323_v56  ;;  %v3407_v55 = vld [vmem:[#allocation2 + $0x364] ss:$16 sps:$4 sm:$0xff]   ;;  %v3410_v56 = vld [vmem:[#allocation2 + $0x36c] ss:$16 sps:$4 sm:$0xff]  }
  0x60   : > { %1928 = vmatpush1.bf16.msra.mxu0 %v3325_v57  ;;  %2140 = vmatpush1.bf16.msra.mxu1 %v3326_v58  ;;  %v3405_v57 = vld [vmem:[#allocation2 + $0x360] ss:$16 sps:$4 sm:$0xff]   ;;  %v3408_v58 = vld [vmem:[#allocation2 + $0x368] ss:$16 sps:$4 sm:$0xff]  }
  0x61   : > { %1929 = vmatprep.subr.bf16.mxu0 %v3327_v59  ;;  %2141 = vmatprep.subr.bf16.mxu1 %v3329_v60  ;;  %v3413_v59 = vld [vmem:[#allocation2 + $0x384] ss:$16 sps:$4 sm:$0xff]   ;;  %v3416_v60 = vld [vmem:[#allocation2 + $0x38c] ss:$16 sps:$4 sm:$0xff]  }
  0x64   : > { %1930 = vmatpush1.bf16.msra.mxu0 %v3331_v61  ;;  %2142 = vmatpush1.bf16.msra.mxu1 %v3332_v62  ;;  %v3411_v61 = vld [vmem:[#allocation2 + $0x380] ss:$16 sps:$4 sm:$0xff]   ;;  %v3414_v62 = vld [vmem:[#allocation2 + $0x388] ss:$16 sps:$4 sm:$0xff]  }
  0x65   : > { %1931 = vmatprep.subr.bf16.mxu0 %v3333_v63  ;;  %2143 = vmatprep.subr.bf16.mxu1 %v3335_v0  ;;  %v3419_v63 = vld [vmem:[#allocation2 + $0x3a4] ss:$16 sps:$4 sm:$0xff]   ;;  %v3422_v0 = vld [vmem:[#allocation2 + $0x3ac] ss:$16 sps:$4 sm:$0xff]  }
  0x68   : > { %1932 = vmatpush1.bf16.msra.mxu0 %v3337_v1  ;;  %2144 = vmatpush1.bf16.msra.mxu1 %v3338_v2  ;;  %v3417_v1 = vld [vmem:[#allocation2 + $0x3a0] ss:$16 sps:$4 sm:$0xff]   ;;  %v3420_v2 = vld [vmem:[#allocation2 + $0x3a8] ss:$16 sps:$4 sm:$0xff]  }
  0x69   : > { %1954 = vmatprep.subr.bf16.mxu0 %v3341_v3  ;;  %2166 = vmatprep.subr.bf16.mxu1 %v3344_v4  ;;  %v3425_v3 = vld [vmem:[#allocation2 + $0x3c4] ss:$16 sps:$4 sm:$0xff]   ;;  %v3428_v4 = vld [vmem:[#allocation2 + $0x3cc] ss:$16 sps:$4 sm:$0xff]  }
  0x6b   : > { %1934 = vmatmul.mubr.bf16.vlgmr.msra.gmra.mrb[0].mxu0 %v2794_v5  ;;  %2146 = vmatmul.mubr.bf16.vlgmr.msra.gmra.mrb[0].mxu1 %v2794_v5  ;;  %v3423_v5 = vld [vmem:[#allocation2 + $0x3c0] ss:$16 sps:$4 sm:$0xff]  }
  0x6c   : > { %1955 = vmatpush1.bf16.msra.mxu0 %v3339_v6  ;;  %2167 = vmatpush1.bf16.msra.mxu1 %v3342_v7  ;;  %v3426_v6 = vld [vmem:[#allocation2 + $0x3c8] ss:$16 sps:$4 sm:$0xff]   ;;  %v3431_v7 = vld [vmem:[#allocation2 + $0x3e4] ss:$16 sps:$4 sm:$0xff]  }
  0x6d   : > { %1956 = vmatprep.subr.bf16.mxu0 %v3347_v8  ;;  %2168 = vmatprep.subr.bf16.mxu1 %v3350_v9  ;;  %v3434_v8 = vld [vmem:[#allocation2 + $0x3ec] ss:$16 sps:$4 sm:$0xff]   ;;  %v3429_v9 = vld [vmem:[#allocation2 + $0x3e0] ss:$16 sps:$4 sm:$0xff]  }
  0x6e   : > { %1943 = vmatprep.mubr.bf16.mxu0 %v2803_v28  ;;  %2155 = vmatprep.mubr.bf16.mxu1 %v2803_v28  ;;  %v3447_v28 = vld [vmem:[#allocation2 + $0x440] ss:$16 sps:$4 sm:$0xff]  }
  0x70   : > { %1957 = vmatpush1.bf16.msra.mxu0 %v3345_v10  ;;  %2169 = vmatpush1.bf16.msra.mxu1 %v3348_v11  ;;  %v3432_v10 = vld [vmem:[#allocation2 + $0x3e8] ss:$16 sps:$4 sm:$0xff]   ;;  %v3437_v11 = vld [vmem:[#allocation2 + $0x404] ss:$16 sps:$4 sm:$0xff]  }
  0x71   : > { %1958 = vmatprep.subr.bf16.mxu0 %v3353_v12  ;;  %2170 = vmatprep.subr.bf16.mxu1 %v3356_v13  ;;  %v3440_v12 = vld [vmem:[#allocation2 + $0x40c] ss:$16 sps:$4 sm:$0xff]   ;;  %v3435_v13 = vld [vmem:[#allocation2 + $0x400] ss:$16 sps:$4 sm:$0xff]  }
  0x73   : > { %1944 = vmatmul.mubr.bf16.gmra.mrb[4].mxu0 %v2802_v31  ;;  %2156 = vmatmul.mubr.bf16.gmra.mrb[4].mxu1 %v2802_v31  ;;  %v3458_v31 = vld [vmem:[#allocation2 + $0x46c] ss:$16 sps:$4 sm:$0xff]  }
  0x74   : > { %1959 = vmatpush1.bf16.msra.mxu0 %v3351_v14  ;;  %2171 = vmatpush1.bf16.msra.mxu1 %v3354_v15  ;;  %v3438_v14 = vld [vmem:[#allocation2 + $0x408] ss:$16 sps:$4 sm:$0xff]   ;;  %v2796_v15 = vcombine.low %v3795_v34, %v3798_v35  ;;  %v3461_v35 = vld [vmem:[#allocation2 + $0x484] ss:$16 sps:$4 sm:$0xff]  }
  0x75   : > { %1960 = vmatprep.subr.bf16.mxu0 %v3359_v16  ;;  %2172 = vmatprep.subr.bf16.mxu1 %v3362_v17  ;;  %v256_v16 = vld [vmem:[%s3788_s16 + $0x48] sm:$0xff] }
  0x76   : > { %1986 = vmatprep.mubr.bf16.mxu0 %v2797_v38  ;;  %2198 = vmatprep.mubr.bf16.mxu1 %v2797_v38  ;;  %v260_v17 = vld [vmem:[%s3788_s16 + $0x68] sm:$0xff] }
  0x77   : > { %v2804_v26 = vcombine.low %v256_v16, %v260_v17  ;;  %v3456_v34 = vld [vmem:[#allocation2 + $0x468] ss:$16 sps:$4 sm:$0xff]  }
  0x78   : > { %1961 = vmatpush1.bf16.msra.mxu0 %v3357_v18  ;;  %2173 = vmatpush1.bf16.msra.mxu1 %v3360_v19  ;;  %v3443_v18 = vld [vmem:[#allocation2 + $0x424] ss:$16 sps:$4 sm:$0xff]   ;;  %v3446_v19 = vld [vmem:[#allocation2 + $0x42c] ss:$16 sps:$4 sm:$0xff]   ;;  %v3462_v38 = vld [vmem:[#allocation2 + $0x488] ss:$16 sps:$4 sm:$0xff]  }
  0x79   : > { %1962 = vmatprep.subr.bf16.mxu0 %v3365_v20  ;;  %2174 = vmatprep.subr.bf16.mxu1 %v3368_v21  ;;  %v2805_v20 = vcombine.high %v256_v16, %v260_v17  ;;  %v3441_v21 = vld [vmem:[#allocation2 + $0x420] ss:$16 sps:$4 sm:$0xff]   ;;  %v3530_v16 = vld [vmem:[#allocation2 + $0x5ec] ss:$16 sps:$4 sm:$0xff]  }
  0x7a   : > { %v3525_v17 = vld [vmem:[#allocation2 + $0x5e0] ss:$16 sps:$4 sm:$0xff]  }
  0x7c   : > { %1963 = vmatpush1.bf16.msra.mxu0 %v3363_v22  ;;  %2175 = vmatpush1.bf16.msra.mxu1 %v3366_v23  ;;  %v3444_v22 = vld [vmem:[#allocation2 + $0x428] ss:$16 sps:$4 sm:$0xff]   ;;  %v3449_v23 = vld [vmem:[#allocation2 + $0x444] ss:$16 sps:$4 sm:$0xff]  }
  0x7d   : > { %1964 = vmatprep.subr.bf16.mxu0 %v3371_v24  ;;  %2176 = vmatprep.subr.bf16.mxu1 %v3374_v25  ;;  %v3452_v24 = vld [vmem:[#allocation2 + $0x44c] ss:$16 sps:$4 sm:$0xff]   ;;  %v3807_v25 = vld [vmem:[%s3788_s16 + $0x10] sm:$0xff] }
  0x80   : > { %1965 = vmatpush1.bf16.msra.mxu0 %v3369_v29  ;;  %2177 = vmatpush1.bf16.msra.mxu1 %v3372_v30  ;;  %v3450_v29 = vld [vmem:[#allocation2 + $0x448] ss:$16 sps:$4 sm:$0xff]   ;;  %v3455_v30 = vld [vmem:[#allocation2 + $0x464] ss:$16 sps:$4 sm:$0xff]  }
  0x81   : > { %1966 = vmatprep.subr.bf16.mxu0 %v3377_v32  ;;  %2178 = vmatprep.subr.bf16.mxu1 %v3380_v33  ;;  %v2799_v32 = vcombine.high %v3807_v25, %v3810_v27  ;;  %v3453_v33 = vld [vmem:[#allocation2 + $0x460] ss:$16 sps:$4 sm:$0xff]  }
  0x84   : > { %1967 = vmatpush1.bf16.msra.mxu0 %v3375_v36  ;;  %2179 = vmatpush1.bf16.msra.mxu1 %v3378_v37  ;;  %v3464_v36 = vld [vmem:[#allocation2 + $0x48c] ss:$16 sps:$4 sm:$0xff]   ;;  %v3459_v37 = vld [vmem:[#allocation2 + $0x480] ss:$16 sps:$4 sm:$0xff]  }
  0x85   : > { %1968 = vmatprep.subr.bf16.mxu0 %v3383_v39  ;;  %2180 = vmatprep.subr.bf16.mxu1 %v3386_v40  ;;  %v3467_v39 = vld [vmem:[#allocation2 + $0x4a4] ss:$16 sps:$4 sm:$0xff]   ;;  %v3470_v40 = vld [vmem:[#allocation2 + $0x4ac] ss:$16 sps:$4 sm:$0xff]  }
  0x88   : > { %1969 = vmatpush1.bf16.msra.mxu0 %v3381_v41  ;;  %2181 = vmatpush1.bf16.msra.mxu1 %v3384_v42  ;;  %v3465_v41 = vld [vmem:[#allocation2 + $0x4a0] ss:$16 sps:$4 sm:$0xff]   ;;  %v3468_v42 = vld [vmem:[#allocation2 + $0x4a8] ss:$16 sps:$4 sm:$0xff]  }
  0x89   : > { %1970 = vmatprep.subr.bf16.mxu0 %v3389_v43  ;;  %2182 = vmatprep.subr.bf16.mxu1 %v3392_v44  ;;  %v3473_v43 = vld [vmem:[#allocation2 + $0x4c4] ss:$16 sps:$4 sm:$0xff]   ;;  %v3476_v44 = vld [vmem:[#allocation2 + $0x4cc] ss:$16 sps:$4 sm:$0xff]  }
  0x8c   : > { %1971 = vmatpush1.bf16.msra.mxu0 %v3387_v45  ;;  %2183 = vmatpush1.bf16.msra.mxu1 %v3390_v46  ;;  %v3471_v45 = vld [vmem:[#allocation2 + $0x4c0] ss:$16 sps:$4 sm:$0xff]   ;;  %v3474_v46 = vld [vmem:[#allocation2 + $0x4c8] ss:$16 sps:$4 sm:$0xff]  }
  0x8d   : > { %1972 = vmatprep.subr.bf16.mxu0 %v3395_v47  ;;  %2184 = vmatprep.subr.bf16.mxu1 %v3398_v48  ;;  %v3479_v47 = vld [vmem:[#allocation2 + $0x4e4] ss:$16 sps:$4 sm:$0xff]   ;;  %v3482_v48 = vld [vmem:[#allocation2 + $0x4ec] ss:$16 sps:$4 sm:$0xff]  }
  0x90   : > { %1973 = vmatpush1.bf16.msra.mxu0 %v3393_v49  ;;  %2185 = vmatpush1.bf16.msra.mxu1 %v3396_v50  ;;  %v3477_v49 = vld [vmem:[#allocation2 + $0x4e0] ss:$16 sps:$4 sm:$0xff]   ;;  %v3480_v50 = vld [vmem:[#allocation2 + $0x4e8] ss:$16 sps:$4 sm:$0xff]  }
  0x91   : > { %1974 = vmatprep.subr.bf16.mxu0 %v3401_v51  ;;  %2186 = vmatprep.subr.bf16.mxu1 %v3404_v52  ;;  %v3485_v51 = vld [vmem:[#allocation2 + $0x504] ss:$16 sps:$4 sm:$0xff]   ;;  %v3488_v52 = vld [vmem:[#allocation2 + $0x50c] ss:$16 sps:$4 sm:$0xff]  }
  0x94   : > { %1975 = vmatpush1.bf16.msra.mxu0 %v3399_v53  ;;  %2187 = vmatpush1.bf16.msra.mxu1 %v3402_v54  ;;  %v3483_v53 = vld [vmem:[#allocation2 + $0x500] ss:$16 sps:$4 sm:$0xff]   ;;  %v3486_v54 = vld [vmem:[#allocation2 + $0x508] ss:$16 sps:$4 sm:$0xff]  }
  0x95   : > { %1976 = vmatprep.subr.bf16.mxu0 %v3407_v55  ;;  %2188 = vmatprep.subr.bf16.mxu1 %v3410_v56  ;;  %v3491_v55 = vld [vmem:[#allocation2 + $0x524] ss:$16 sps:$4 sm:$0xff]   ;;  %v3494_v56 = vld [vmem:[#allocation2 + $0x52c] ss:$16 sps:$4 sm:$0xff]  }
  0x98   : > { %1977 = vmatpush1.bf16.msra.mxu0 %v3405_v57  ;;  %2189 = vmatpush1.bf16.msra.mxu1 %v3408_v58  ;;  %v3489_v57 = vld [vmem:[#allocation2 + $0x520] ss:$16 sps:$4 sm:$0xff]   ;;  %v3492_v58 = vld [vmem:[#allocation2 + $0x528] ss:$16 sps:$4 sm:$0xff]  }
  0x99   : > { %1978 = vmatprep.subr.bf16.mxu0 %v3413_v59  ;;  %2190 = vmatprep.subr.bf16.mxu1 %v3416_v60  ;;  %v3497_v59 = vld [vmem:[#allocation2 + $0x544] ss:$16 sps:$4 sm:$0xff]   ;;  %v3500_v60 = vld [vmem:[#allocation2 + $0x54c] ss:$16 sps:$4 sm:$0xff]  }
  0x9c   : > { %1979 = vmatpush1.bf16.msra.mxu0 %v3411_v61  ;;  %2191 = vmatpush1.bf16.msra.mxu1 %v3414_v62  ;;  %v3495_v61 = vld [vmem:[#allocation2 + $0x540] ss:$16 sps:$4 sm:$0xff]   ;;  %v3498_v62 = vld [vmem:[#allocation2 + $0x548] ss:$16 sps:$4 sm:$0xff]  }
  0x9d   : > { %1980 = vmatprep.subr.bf16.mxu0 %v3419_v63  ;;  %2192 = vmatprep.subr.bf16.mxu1 %v3422_v0  ;;  %v3503_v63 = vld [vmem:[#allocation2 + $0x564] ss:$16 sps:$4 sm:$0xff]   ;;  %v3506_v0 = vld [vmem:[#allocation2 + $0x56c] ss:$16 sps:$4 sm:$0xff]  }
  0xa0   : > { %1981 = vmatpush1.bf16.msra.mxu0 %v3417_v1  ;;  %2193 = vmatpush1.bf16.msra.mxu1 %v3420_v2  ;;  %v3501_v1 = vld [vmem:[#allocation2 + $0x560] ss:$16 sps:$4 sm:$0xff]   ;;  %v3504_v2 = vld [vmem:[#allocation2 + $0x568] ss:$16 sps:$4 sm:$0xff]  }
  0xa1   : > { %1982 = vmatprep.subr.bf16.mxu0 %v3425_v3  ;;  %2194 = vmatprep.subr.bf16.mxu1 %v3428_v4  ;;  %v3509_v3 = vld [vmem:[#allocation2 + $0x584] ss:$16 sps:$4 sm:$0xff]   ;;  %v3512_v4 = vld [vmem:[#allocation2 + $0x58c] ss:$16 sps:$4 sm:$0xff]  }
  0xa4   : > { %1983 = vmatpush1.bf16.msra.mxu0 %v3423_v5  ;;  %2195 = vmatpush1.bf16.msra.mxu1 %v3426_v6  ;;  %v3507_v5 = vld [vmem:[#allocation2 + $0x580] ss:$16 sps:$4 sm:$0xff]   ;;  %v3510_v6 = vld [vmem:[#allocation2 + $0x588] ss:$16 sps:$4 sm:$0xff]  }
  0xa5   : > { %1984 = vmatprep.subr.bf16.mxu0 %v3431_v7  ;;  %2196 = vmatprep.subr.bf16.mxu1 %v3434_v8  ;;  %v3515_v7 = vld [vmem:[#allocation2 + $0x5a4] ss:$16 sps:$4 sm:$0xff]   ;;  %v3518_v8 = vld [vmem:[#allocation2 + $0x5ac] ss:$16 sps:$4 sm:$0xff]  }
  0xa8   : > { %1985 = vmatpush1.bf16.msra.mxu0 %v3429_v9  ;;  %2197 = vmatpush1.bf16.msra.mxu1 %v3432_v10  ;;  %v3513_v9 = vld [vmem:[#allocation2 + $0x5a0] ss:$16 sps:$4 sm:$0xff]   ;;  %v3516_v10 = vld [vmem:[#allocation2 + $0x5a8] ss:$16 sps:$4 sm:$0xff]  }
  0xa9   : > { %2007 = vmatprep.subr.bf16.mxu0 %v3437_v11  ;;  %2219 = vmatprep.subr.bf16.mxu1 %v3440_v12  ;;  %v3521_v11 = vld [vmem:[#allocation2 + $0x5c4] ss:$16 sps:$4 sm:$0xff]   ;;  %v3524_v12 = vld [vmem:[#allocation2 + $0x5cc] ss:$16 sps:$4 sm:$0xff]  }
  0xab   : > { %1987 = vmatmul.mubr.bf16.vlgmr.msra.gmra.mrb[0].mxu0 %v2796_v15  ;;  %2199 = vmatmul.mubr.bf16.vlgmr.msra.gmra.mrb[0].mxu1 %v2796_v15  ;;  %v3527_v15 = vld [vmem:[#allocation2 + $0x5e4] ss:$16 sps:$4 sm:$0xff]  }
  0xac   : > { %2008 = vmatpush1.bf16.msra.mxu0 %v3435_v13  ;;  %2220 = vmatpush1.bf16.msra.mxu1 %v3438_v14  ;;  %v3519_v13 = vld [vmem:[#allocation2 + $0x5c0] ss:$16 sps:$4 sm:$0xff]   ;;  %v3522_v14 = vld [vmem:[#allocation2 + $0x5c8] ss:$16 sps:$4 sm:$0xff]  }
  0xad   : > { %2009 = vmatprep.subr.bf16.mxu0 %v3443_v18  ;;  %2221 = vmatprep.subr.bf16.mxu1 %v3446_v19  ;;  %v3528_v18 = vld [vmem:[#allocation2 + $0x5e8] ss:$16 sps:$4 sm:$0xff]   ;;  %v3533_v19 = vld [vmem:[#allocation2 + $0x604] ss:$16 sps:$4 sm:$0xff]  }
  0xae   : > { %1996 = vmatprep.mubr.bf16.mxu0 %v2805_v20  ;;  %2208 = vmatprep.mubr.bf16.mxu1 %v2805_v20  ;;  %v3536_v20 = vld [vmem:[#allocation2 + $0x60c] ss:$16 sps:$4 sm:$0xff]  }
  0xb0   : > { %2010 = vmatpush1.bf16.msra.mxu0 %v3441_v21  ;;  %2222 = vmatpush1.bf16.msra.mxu1 %v3444_v22  ;;  %v3531_v21 = vld [vmem:[#allocation2 + $0x600] ss:$16 sps:$4 sm:$0xff]   ;;  %v3534_v22 = vld [vmem:[#allocation2 + $0x608] ss:$16 sps:$4 sm:$0xff]  }
  0xb1   : > { %2011 = vmatprep.subr.bf16.mxu0 %v3449_v23  ;;  %2223 = vmatprep.subr.bf16.mxu1 %v3452_v24  ;;  %v257_v23 = vld [vmem:[%s3788_s16 + $0x50] sm:$0xff]  ;;  %v2798_v24 = vcombine.low %v3807_v25, %v3810_v27  ;;  %v3819_v25 = vld [vmem:[%s3788_s16 + $0x18] sm:$0xff] }
  0xb2   : > { %v3543_v27 = vld [vmem:[#allocation2 + $0x640] ss:$16 sps:$4 sm:$0xff]  }
  0xb3   : > { %1997 = vmatmul.mubr.bf16.gmra.mrb[4].mxu0 %v2804_v26  ;;  %2209 = vmatmul.mubr.bf16.gmra.mrb[4].mxu1 %v2804_v26  ;;  %v261_v26 = vld [vmem:[%s3788_s16 + $0x70] sm:$0xff] }
  0xb4   : > { %2012 = vmatpush1.bf16.msra.mxu0 %v3447_v28  ;;  %2224 = vmatpush1.bf16.msra.mxu1 %v3450_v29  ;;  %v3539_v28 = vld [vmem:[#allocation2 + $0x624] ss:$16 sps:$4 sm:$0xff]   ;;  %v3542_v29 = vld [vmem:[#allocation2 + $0x62c] ss:$16 sps:$4 sm:$0xff]  }
  0xb5   : > { %2013 = vmatprep.subr.bf16.mxu0 %v3455_v30  ;;  %2225 = vmatprep.subr.bf16.mxu1 %v3458_v31  ;;  %v3537_v30 = vld [vmem:[#allocation2 + $0x620] ss:$16 sps:$4 sm:$0xff]   ;;  %v3540_v31 = vld [vmem:[#allocation2 + $0x628] ss:$16 sps:$4 sm:$0xff]  }
  0xb6   : > { %2039 = vmatprep.mubr.bf16.mxu0 %v2799_v32  ;;  %2251 = vmatprep.mubr.bf16.mxu1 %v2799_v32  ;;  %v2807_v32 = vcombine.high %v257_v23, %v261_v26 }
  0xb8   : > { %2014 = vmatpush1.bf16.msra.mxu0 %v3453_v33  ;;  %2226 = vmatpush1.bf16.msra.mxu1 %v3456_v34  ;;  %v3545_v33 = vld [vmem:[#allocation2 + $0x644] ss:$16 sps:$4 sm:$0xff]   ;;  %v3548_v34 = vld [vmem:[#allocation2 + $0x64c] ss:$16 sps:$4 sm:$0xff]  }
  0xb9   : > { %2015 = vmatprep.subr.bf16.mxu0 %v3461_v35  ;;  %2227 = vmatprep.subr.bf16.mxu1 %v3464_v36  ;;  %v3546_v35 = vld [vmem:[#allocation2 + $0x648] ss:$16 sps:$4 sm:$0xff]  }
  0xba   : > { %v3822_v36 = vld [vmem:[%s3788_s16 + $0x38] sm:$0xff] }
  0xbc   : > { %2016 = vmatpush1.bf16.msra.mxu0 %v3459_v37  ;;  %2228 = vmatpush1.bf16.msra.mxu1 %v3462_v38  ;;  %v3551_v37 = vld [vmem:[#allocation2 + $0x664] ss:$16 sps:$4 sm:$0xff]   ;;  %v3554_v38 = vld [vmem:[#allocation2 + $0x66c] ss:$16 sps:$4 sm:$0xff]  }
  0xbd   : > { %2017 = vmatprep.subr.bf16.mxu0 %v3467_v39  ;;  %2229 = vmatprep.subr.bf16.mxu1 %v3470_v40  ;;  %v2806_v39 = vcombine.low %v257_v23, %v261_v26  ;;  %v3549_v40 = vld [vmem:[#allocation2 + $0x660] ss:$16 sps:$4 sm:$0xff]   ;;  %v3623_v23 = vld [vmem:[#allocation2 + $0x7e4] ss:$16 sps:$4 sm:$0xff]  }
  0xbe   : > { %v3621_v26 = vld [vmem:[#allocation2 + $0x7e0] ss:$16 sps:$4 sm:$0xff]  }
  0xc0   : > { %2018 = vmatpush1.bf16.msra.mxu0 %v3465_v41  ;;  %2230 = vmatpush1.bf16.msra.mxu1 %v3468_v42  ;;  %v3552_v41 = vld [vmem:[#allocation2 + $0x668] ss:$16 sps:$4 sm:$0xff]   ;;  %v2801_v42 = vcombine.high %v3819_v25, %v3822_v36 }
  0xc1   : > { %2019 = vmatprep.subr.bf16.mxu0 %v3473_v43  ;;  %2231 = vmatprep.subr.bf16.mxu1 %v3476_v44  ;;  %v3557_v43 = vld [vmem:[#allocation2 + $0x684] ss:$16 sps:$4 sm:$0xff]   ;;  %v3560_v44 = vld [vmem:[#allocation2 + $0x68c] ss:$16 sps:$4 sm:$0xff]  }
  0xc4   : > { %2020 = vmatpush1.bf16.msra.mxu0 %v3471_v45  ;;  %2232 = vmatpush1.bf16.msra.mxu1 %v3474_v46  ;;  %v3555_v45 = vld [vmem:[#allocation2 + $0x680] ss:$16 sps:$4 sm:$0xff]   ;;  %v3558_v46 = vld [vmem:[#allocation2 + $0x688] ss:$16 sps:$4 sm:$0xff]  }
  0xc5   : > { %2021 = vmatprep.subr.bf16.mxu0 %v3479_v47  ;;  %2233 = vmatprep.subr.bf16.mxu1 %v3482_v48  ;;  %v3563_v47 = vld [vmem:[#allocation2 + $0x6a4] ss:$16 sps:$4 sm:$0xff]   ;;  %v3566_v48 = vld [vmem:[#allocation2 + $0x6ac] ss:$16 sps:$4 sm:$0xff]  }
  0xc8   : > { %2022 = vmatpush1.bf16.msra.mxu0 %v3477_v49  ;;  %2234 = vmatpush1.bf16.msra.mxu1 %v3480_v50  ;;  %v3561_v49 = vld [vmem:[#allocation2 + $0x6a0] ss:$16 sps:$4 sm:$0xff]   ;;  %v3564_v50 = vld [vmem:[#allocation2 + $0x6a8] ss:$16 sps:$4 sm:$0xff]  }
  0xc9   : > { %2023 = vmatprep.subr.bf16.mxu0 %v3485_v51  ;;  %2235 = vmatprep.subr.bf16.mxu1 %v3488_v52  ;;  %v3569_v51 = vld [vmem:[#allocation2 + $0x6c4] ss:$16 sps:$4 sm:$0xff]   ;;  %v3572_v52 = vld [vmem:[#allocation2 + $0x6cc] ss:$16 sps:$4 sm:$0xff]  }
  0xcc   : > { %2024 = vmatpush1.bf16.msra.mxu0 %v3483_v53  ;;  %2236 = vmatpush1.bf16.msra.mxu1 %v3486_v54  ;;  %v3567_v53 = vld [vmem:[#allocation2 + $0x6c0] ss:$16 sps:$4 sm:$0xff]   ;;  %v3570_v54 = vld [vmem:[#allocation2 + $0x6c8] ss:$16 sps:$4 sm:$0xff]  }
  0xcd   : > { %2025 = vmatprep.subr.bf16.mxu0 %v3491_v55  ;;  %2237 = vmatprep.subr.bf16.mxu1 %v3494_v56  ;;  %v3575_v55 = vld [vmem:[#allocation2 + $0x6e4] ss:$16 sps:$4 sm:$0xff]   ;;  %v3578_v56 = vld [vmem:[#allocation2 + $0x6ec] ss:$16 sps:$4 sm:$0xff]  }
  0xd0   : > { %2026 = vmatpush1.bf16.msra.mxu0 %v3489_v57  ;;  %2238 = vmatpush1.bf16.msra.mxu1 %v3492_v58  ;;  %v3573_v57 = vld [vmem:[#allocation2 + $0x6e0] ss:$16 sps:$4 sm:$0xff]   ;;  %v3576_v58 = vld [vmem:[#allocation2 + $0x6e8] ss:$16 sps:$4 sm:$0xff]  }
  0xd1   : > { %2027 = vmatprep.subr.bf16.mxu0 %v3497_v59  ;;  %2239 = vmatprep.subr.bf16.mxu1 %v3500_v60  ;;  %v3581_v59 = vld [vmem:[#allocation2 + $0x704] ss:$16 sps:$4 sm:$0xff]   ;;  %v3584_v60 = vld [vmem:[#allocation2 + $0x70c] ss:$16 sps:$4 sm:$0xff]  }
  0xd4   : > { %2028 = vmatpush1.bf16.msra.mxu0 %v3495_v61  ;;  %2240 = vmatpush1.bf16.msra.mxu1 %v3498_v62  ;;  %v3579_v61 = vld [vmem:[#allocation2 + $0x700] ss:$16 sps:$4 sm:$0xff]   ;;  %v3582_v62 = vld [vmem:[#allocation2 + $0x708] ss:$16 sps:$4 sm:$0xff]  }
  0xd5   : > { %2029 = vmatprep.subr.bf16.mxu0 %v3503_v63  ;;  %2241 = vmatprep.subr.bf16.mxu1 %v3506_v0  ;;  %v3587_v63 = vld [vmem:[#allocation2 + $0x724] ss:$16 sps:$4 sm:$0xff]   ;;  %v3590_v0 = vld [vmem:[#allocation2 + $0x72c] ss:$16 sps:$4 sm:$0xff]  }
  0xd8   : > { %2030 = vmatpush1.bf16.msra.mxu0 %v3501_v1  ;;  %2242 = vmatpush1.bf16.msra.mxu1 %v3504_v2  ;;  %v3585_v1 = vld [vmem:[#allocation2 + $0x720] ss:$16 sps:$4 sm:$0xff]   ;;  %v3588_v2 = vld [vmem:[#allocation2 + $0x728] ss:$16 sps:$4 sm:$0xff]  }
  0xd9   : > { %2031 = vmatprep.subr.bf16.mxu0 %v3509_v3  ;;  %2243 = vmatprep.subr.bf16.mxu1 %v3512_v4  ;;  %v3593_v3 = vld [vmem:[#allocation2 + $0x744] ss:$16 sps:$4 sm:$0xff]   ;;  %v3596_v4 = vld [vmem:[#allocation2 + $0x74c] ss:$16 sps:$4 sm:$0xff]  }
  0xdc   : > { %2032 = vmatpush1.bf16.msra.mxu0 %v3507_v5  ;;  %2244 = vmatpush1.bf16.msra.mxu1 %v3510_v6  ;;  %v3591_v5 = vld [vmem:[#allocation2 + $0x740] ss:$16 sps:$4 sm:$0xff]   ;;  %v3594_v6 = vld [vmem:[#allocation2 + $0x748] ss:$16 sps:$4 sm:$0xff]  }
  0xdd   : > { %2033 = vmatprep.subr.bf16.mxu0 %v3515_v7  ;;  %2245 = vmatprep.subr.bf16.mxu1 %v3518_v8  ;;  %v3599_v7 = vld [vmem:[#allocation2 + $0x764] ss:$16 sps:$4 sm:$0xff]   ;;  %v3602_v8 = vld [vmem:[#allocation2 + $0x76c] ss:$16 sps:$4 sm:$0xff]  }
  0xe0   : > { %2034 = vmatpush1.bf16.msra.mxu0 %v3513_v9  ;;  %2246 = vmatpush1.bf16.msra.mxu1 %v3516_v10  ;;  %v3597_v9 = vld [vmem:[#allocation2 + $0x760] ss:$16 sps:$4 sm:$0xff]   ;;  %v3600_v10 = vld [vmem:[#allocation2 + $0x768] ss:$16 sps:$4 sm:$0xff]  }
  0xe1   : > { %2035 = vmatprep.subr.bf16.mxu0 %v3521_v11  ;;  %2247 = vmatprep.subr.bf16.mxu1 %v3524_v12  ;;  %v3605_v11 = vld [vmem:[#allocation2 + $0x784] ss:$16 sps:$4 sm:$0xff]   ;;  %v3608_v12 = vld [vmem:[#allocation2 + $0x78c] ss:$16 sps:$4 sm:$0xff]  }
  0xe4   : > { %2036 = vmatpush1.bf16.msra.mxu0 %v3519_v13  ;;  %2248 = vmatpush1.bf16.msra.mxu1 %v3522_v14  ;;  %v3603_v13 = vld [vmem:[#allocation2 + $0x780] ss:$16 sps:$4 sm:$0xff]   ;;  %v3606_v14 = vld [vmem:[#allocation2 + $0x788] ss:$16 sps:$4 sm:$0xff]  }
  0xe5   : > { %2037 = vmatprep.subr.bf16.mxu0 %v3527_v15  ;;  %2249 = vmatprep.subr.bf16.mxu1 %v3530_v16  ;;  %v3611_v15 = vld [vmem:[#allocation2 + $0x7a4] ss:$16 sps:$4 sm:$0xff]   ;;  %v3614_v16 = vld [vmem:[#allocation2 + $0x7ac] ss:$16 sps:$4 sm:$0xff]  }
  0xe8   : > { %2038 = vmatpush1.bf16.msra.mxu0 %v3525_v17  ;;  %2250 = vmatpush1.bf16.msra.mxu1 %v3528_v18  ;;  %v3609_v17 = vld [vmem:[#allocation2 + $0x7a0] ss:$16 sps:$4 sm:$0xff]   ;;  %v3612_v18 = vld [vmem:[#allocation2 + $0x7a8] ss:$16 sps:$4 sm:$0xff]  }
  0xe9   : > { %2060 = vmatprep.subr.bf16.mxu0 %v3533_v19  ;;  %2272 = vmatprep.subr.bf16.mxu1 %v3536_v20  ;;  %v3617_v19 = vld [vmem:[#allocation2 + $0x7c4] ss:$16 sps:$4 sm:$0xff]   ;;  %v3620_v20 = vld [vmem:[#allocation2 + $0x7cc] ss:$16 sps:$4 sm:$0xff]  }
  0xeb   : > { %2040 = vmatmul.mubr.bf16.vlgmr.msra.gmra.mrb[0].mxu0 %v2798_v24  ;;  %2252 = vmatmul.mubr.bf16.vlgmr.msra.gmra.mrb[0].mxu1 %v2798_v24  ;;  %v3626_v24 = vld [vmem:[#allocation2 + $0x7ec] ss:$16 sps:$4 sm:$0xff]  }
  0xec   : > { %2061 = vmatpush1.bf16.msra.mxu0 %v3531_v21  ;;  %2273 = vmatpush1.bf16.msra.mxu1 %v3534_v22  ;;  %v3615_v21 = vld [vmem:[#allocation2 + $0x7c0] ss:$16 sps:$4 sm:$0xff]   ;;  %v3618_v22 = vld [vmem:[#allocation2 + $0x7c8] ss:$16 sps:$4 sm:$0xff]  }
  0xed   : > { %2062 = vmatprep.subr.bf16.mxu0 %v3539_v28  ;;  %2274 = vmatprep.subr.bf16.mxu1 %v3542_v29  ;;  %v3624_v28 = vld [vmem:[#allocation2 + $0x7e8] ss:$16 sps:$4 sm:$0xff]  }
  0xee   : > { %2049 = vmatprep.mubr.bf16.mxu0 %v2807_v32  ;;  %2261 = vmatprep.mubr.bf16.mxu1 %v2807_v32  ;;  %v258_v29 = vld [vmem:[%s3788_s16 + $0x58] sm:$0xff]  ;;  %v3628_v32 = vld [vmem:[%s3942_s3 + $0xc0] sm:$0xff]  }
  0xf0   : > { %2063 = vmatpush1.bf16.msra.mxu0 %v3537_v30  ;;  %2275 = vmatpush1.bf16.msra.mxu1 %v3540_v31  ;;  %v262_v30 = vld [vmem:[%s3788_s16 + $0x78] sm:$0xff]  ;;  %v3627_v31 = vld [vmem:[%s3942_s3 + $0x40] sm:$0xff]   ;;  %s2793_s16 = sshll.u32 %s3954_s12, 3 }
  0xf1   : > { %2064 = vmatprep.subr.bf16.mxu0 %v3545_v33  ;;  %2276 = vmatprep.subr.bf16.mxu1 %v3548_v34  ;;  %v2800_v33 = vcombine.low %v3819_v25, %v3822_v36  ;;  %v2809_v34 = vcombine.high %v258_v29, %v262_v30  ;;  %v3632_v25 = vld [vmem:[%s3942_s3 + $0xc8] sm:$0xff]   ;;  %s244_s20 = scalar_lea.vmem %s3944_s5, %s2793_s16 }
  0xf2   : > { %v3633_v36 = vld [vmem:[%s3942_s3 + $0x8] sm:$0xff]  }
  0xf3   : > { %2050 = vmatmul.mubr.bf16.gmra.mrb[4].mxu0 %v2806_v39  ;;  %2262 = vmatmul.mubr.bf16.gmra.mrb[4].mxu1 %v2806_v39  ;;  %v3635_v39 = vld [vmem:[%s3942_s3 + $0x50] sm:$0xff]  }
  0xf4   : > { %2065 = vmatpush1.bf16.msra.mxu0 %v3543_v27  ;;  %2277 = vmatpush1.bf16.msra.mxu1 %v3546_v35  ;;  %v3629_v27 = vld [vmem:[%s3942_s3] sm:$0xff]  }
  0xf5   : > { %2066 = vmatprep.subr.bf16.mxu0 %v3551_v37  ;;  %2278 = vmatprep.subr.bf16.mxu1 %v3554_v38  ;;  %v3630_v35 = vld [vmem:[%s3942_s3 + $0x80] sm:$0xff]   ;;  %v3631_v37 = vld [vmem:[%s3942_s3 + $0x48] sm:$0xff]  }
  0xf6   : > { %2092 = vmatprep.mubr.bf16.mxu0 %v2801_v42  ;;  %2304 = vmatprep.mubr.bf16.mxu1 %v2801_v42  ;;  %v3634_v38 = vld [vmem:[%s3942_s3 + $0x88] sm:$0xff]   ;;  %v3637_v42 = vld [vmem:[%s3942_s3 + $0x10] sm:$0xff]  }
  0xf8   : > { %2067 = vmatpush1.bf16.msra.mxu0 %v3549_v40  ;;  %2279 = vmatpush1.bf16.msra.mxu1 %v3552_v41  ;;  %v3636_v40 = vld [vmem:[%s3942_s3 + $0xd0] sm:$0xff]   ;;  %v2808_v41 = vcombine.low %v258_v29, %v262_v30 }
  0xf9   : > { %2068 = vmatprep.subr.bf16.mxu0 %v3557_v43  ;;  %2280 = vmatprep.subr.bf16.mxu1 %v3560_v44  ;;  %v3638_v43 = vld [vmem:[%s3942_s3 + $0x90] sm:$0xff]   ;;  %v3639_v44 = vld [vmem:[%s3942_s3 + $0x58] sm:$0xff]  }
  0xfc   : > { %2069 = vmatpush1.bf16.msra.mxu0 %v3555_v45  ;;  %2281 = vmatpush1.bf16.msra.mxu1 %v3558_v46  ;;  %v3640_v45 = vld [vmem:[%s3942_s3 + $0xd8] sm:$0xff]  }
  0xfd   : > { %2070 = vmatprep.subr.bf16.mxu0 %v3563_v47  ;;  %2282 = vmatprep.subr.bf16.mxu1 %v3566_v48  ;;  %v3641_v46 = vld [vmem:[%s3942_s3 + $0x18] sm:$0xff]   ;;  %v3643_v48 = vld [vmem:[%s3942_s3 + $0x60] sm:$0xff]  }
  0xfe   : > { %v3642_v47 = vld [vmem:[%s3942_s3 + $0x98] sm:$0xff]  }
 0x100   : > { %2071 = vmatpush1.bf16.msra.mxu0 %v3561_v49  ;;  %2283 = vmatpush1.bf16.msra.mxu1 %v3564_v50  ;;  %v3644_v49 = vld [vmem:[%s3942_s3 + $0xe0] sm:$0xff]  }
 0x101   : > { %2072 = vmatprep.subr.bf16.mxu0 %v3569_v51  ;;  %2284 = vmatprep.subr.bf16.mxu1 %v3572_v52  ;;  %v3645_v50 = vld [vmem:[%s3942_s3 + $0x20] sm:$0xff]   ;;  %v3647_v52 = vld [vmem:[%s3942_s3 + $0x68] sm:$0xff]  }
 0x102   : > { %v3646_v51 = vld [vmem:[%s3942_s3 + $0xa0] sm:$0xff]  }
 0x104   : > { %2073 = vmatpush1.bf16.msra.mxu0 %v3567_v53  ;;  %2285 = vmatpush1.bf16.msra.mxu1 %v3570_v54  ;;  %v3648_v53 = vld [vmem:[%s3942_s3 + $0xe8] sm:$0xff]  }
 0x105   : > { %2074 = vmatprep.subr.bf16.mxu0 %v3575_v55  ;;  %2286 = vmatprep.subr.bf16.mxu1 %v3578_v56  ;;  %v3649_v54 = vld [vmem:[%s3942_s3 + $0x28] sm:$0xff]   ;;  %v3651_v56 = vld [vmem:[%s3942_s3 + $0x70] sm:$0xff]  }
 0x106   : > { %v3650_v55 = vld [vmem:[%s3942_s3 + $0xa8] sm:$0xff]  }
 0x108   : > { %2075 = vmatpush1.bf16.msra.mxu0 %v3573_v57  ;;  %2287 = vmatpush1.bf16.msra.mxu1 %v3576_v58  ;;  %v3652_v57 = vld [vmem:[%s3942_s3 + $0xf0] sm:$0xff]  }
 0x109   : > { %2076 = vmatprep.subr.bf16.mxu0 %v3581_v59  ;;  %2288 = vmatprep.subr.bf16.mxu1 %v3584_v60  ;;  %v3653_v58 = vld [vmem:[%s3942_s3 + $0x30] sm:$0xff]   ;;  %v3655_v60 = vld [vmem:[%s3942_s3 + $0x78] sm:$0xff]  }
 0x10a   : > { %v3654_v59 = vld [vmem:[%s3942_s3 + $0xb0] sm:$0xff]  }
 0x10c   : > { %2077 = vmatpush1.bf16.msra.mxu0 %v3579_v61  ;;  %2289 = vmatpush1.bf16.msra.mxu1 %v3582_v62  ;;  %v3656_v61 = vld [vmem:[%s3942_s3 + $0xf8] sm:$0xff]  }
 0x10d   : > { %2078 = vmatprep.subr.bf16.mxu0 %v3587_v63  ;;  %2290 = vmatprep.subr.bf16.mxu1 %v3590_v0  ;;  %v3657_v62 = vld [vmem:[%s3942_s3 + $0x38] sm:$0xff]   ;;  %v521_v0 = vlaneseq }
 0x10e   : > { %v3658_v63 = vld [vmem:[%s3942_s3 + $0xb8] sm:$0xff]  }
 0x110   : > { %2079 = vmatpush1.bf16.msra.mxu0 %v3585_v1  ;;  %2291 = vmatpush1.bf16.msra.mxu1 %v3588_v2  ;;  %v522_v1 = vshrl.u32 %v521_v0, 7 }
 0x111   : > { %2080 = vmatprep.subr.bf16.mxu0 %v3593_v3  ;;  %2292 = vmatprep.subr.bf16.mxu1 %v3596_v4  ;;  %v519_v4 = vld [vmem:[%s3941_s2] sm:$0xf] }
 0x112   : > { %v523_v2 = vsub.s32 0, %v522_v1  ;;  %v531_v3 = vsub.s32 2, %v522_v1 }
 0x114   : > { %2081 = vmatpush1.bf16.msra.mxu0 %v3591_v5  ;;  %2293 = vmatpush1.bf16.msra.mxu1 %v3594_v6  ;;  %v527_v5 = vsub.s32 1, %v522_v1  ;;  %v535_v6 = vsub.s32 3, %v522_v1 }
 0x115   : > { %2082 = vmatprep.subr.bf16.mxu0 %v3599_v7  ;;  %2294 = vmatprep.subr.bf16.mxu1 %v3602_v8  ;;  %v524_v7 = vrot.slane %v519_v4, %v523_v2  ;;  %v532_v8 = vrot.slane %v519_v4, %v531_v3 }
 0x118   : > { %2083 = vmatpush1.bf16.msra.mxu0 %v3597_v9  ;;  %2295 = vmatpush1.bf16.msra.mxu1 %v3600_v10  ;;  %v528_v9 = vrot.slane %v519_v4, %v527_v5  ;;  %v536_v10 = vrot.slane %v519_v4, %v535_v6  ;;  %v3066_v5 = vld [vmem:[%s3943_s4] ss:$0 sm:$0xff] }
 0x119   : > { %2084 = vmatprep.subr.bf16.mxu0 %v3605_v11  ;;  %2296 = vmatprep.subr.bf16.mxu1 %v3608_v12 }
 0x11c   : > { %2085 = vmatpush1.bf16.msra.mxu0 %v3603_v13  ;;  %2297 = vmatpush1.bf16.msra.mxu1 %v3606_v14 }
 0x11d   : > { %2086 = vmatprep.subr.bf16.mxu0 %v3611_v15  ;;  %2298 = vmatprep.subr.bf16.mxu1 %v3614_v16 }
 0x120   : > { %2087 = vmatpush1.bf16.msra.mxu0 %v3609_v17  ;;  %2299 = vmatpush1.bf16.msra.mxu1 %v3612_v18 }
 0x121   : > { %2088 = vmatprep.subr.bf16.mxu0 %v3617_v19  ;;  %2300 = vmatprep.subr.bf16.mxu1 %v3620_v20 }
 0x124   : > { %2089 = vmatpush1.bf16.msra.mxu0 %v3615_v21  ;;  %2301 = vmatpush1.bf16.msra.mxu1 %v3618_v22 }
 0x125   : > { %2090 = vmatprep.subr.bf16.mxu0 %v3623_v23  ;;  %2302 = vmatprep.subr.bf16.mxu1 %v3626_v24 }
 0x128   : > { %2091 = vmatpush1.bf16.msra.mxu0 %v3621_v26  ;;  %2303 = vmatpush1.bf16.msra.mxu1 %v3624_v28 }
 0x129   : > { %3102 = vmatprep.subr.bf16.mxu0 %v3627_v31  ;;  %3130 = vmatprep.subr.bf16.mxu1 %v3628_v32 }
 0x12b   : > { %2093 = vmatmul.mubr.bf16.vlgmr.msra.gmra.mrb[0].mxu0 %v2800_v33  ;;  %2305 = vmatmul.mubr.bf16.vlgmr.msra.gmra.mrb[0].mxu1 %v2800_v33 }
 0x12c   : > { %2102 = vmatprep.mubr.bf16.mxu0 %v2809_v34  ;;  %2314 = vmatprep.mubr.bf16.mxu1 %v2809_v34 }
 0x12d   : > { %3103 = vmatpush3.bf16.msra.mxu0 %v3629_v27  ;;  %3131 = vmatpush3.bf16.msra.mxu1 %v3630_v35 }
 0x12e   : > { %3104 = vmatprep.subr.bf16.mxu0 %v3631_v37  ;;  %3132 = vmatprep.subr.bf16.mxu1 %v3632_v25 }
 0x131   : > { %3105 = vmatpush3.bf16.msra.mxu0 %v3633_v36  ;;  %3133 = vmatpush3.bf16.msra.mxu1 %v3634_v38 }
 0x132   : > { %3106 = vmatprep.subr.bf16.mxu0 %v3635_v39  ;;  %3134 = vmatprep.subr.bf16.mxu1 %v3636_v40 }
 0x133   : > { %2103 = vmatmul.mubr.bf16.gmra.mrb[4].mxu0 %v2808_v41  ;;  %2315 = vmatmul.mubr.bf16.gmra.mrb[4].mxu1 %v2808_v41 }
 0x135   : > { %3107 = vmatpush3.bf16.msra.mxu0 %v3637_v42  ;;  %3135 = vmatpush3.bf16.msra.mxu1 %v3638_v43 }
 0x136   : > { %3108 = vmatprep.subr.bf16.mxu0 %v3639_v44  ;;  %3136 = vmatprep.subr.bf16.mxu1 %v3640_v45 }
 0x139   : > { %3109 = vmatpush3.bf16.msra.mxu0 %v3641_v46  ;;  %3137 = vmatpush3.bf16.msra.mxu1 %v3642_v47 }
 0x13a   : > { %3110 = vmatprep.subr.bf16.mxu0 %v3643_v48  ;;  %3138 = vmatprep.subr.bf16.mxu1 %v3644_v49 }
 0x13d   : > { %3111 = vmatpush3.bf16.msra.mxu0 %v3645_v50  ;;  %3139 = vmatpush3.bf16.msra.mxu1 %v3646_v51 }
 0x13e   : > { %3112 = vmatprep.subr.bf16.mxu0 %v3647_v52  ;;  %3140 = vmatprep.subr.bf16.mxu1 %v3648_v53 }
 0x141   : > { %3113 = vmatpush3.bf16.msra.mxu0 %v3649_v54  ;;  %3141 = vmatpush3.bf16.msra.mxu1 %v3650_v55 }
 0x142   : > { %3114 = vmatprep.subr.bf16.mxu0 %v3651_v56  ;;  %3142 = vmatprep.subr.bf16.mxu1 %v3652_v57 }
 0x145   : > { %3115 = vmatpush3.bf16.msra.mxu0 %v3653_v58  ;;  %3143 = vmatpush3.bf16.msra.mxu1 %v3654_v59 }
 0x146   : > { %3116 = vmatprep.subr.bf16.mxu0 %v3655_v60  ;;  %3144 = vmatprep.subr.bf16.mxu1 %v3656_v61 }
 0x149   : > { %3117 = vmatpush3.bf16.msra.mxu0 %v3657_v62  ;;  %3145 = vmatpush3.bf16.msra.mxu1 %v3658_v63 }
 0x1fe   : > { %v2094_v11 = vpop.f32.mrb[0].mxu0  ;;  %v2306_v12 = vpop.f32.mrb[0].mxu1 }
 0x1ff   : > { %v3158_v13 = vadd.f32 %v2094_v11, %v524_v7  ;;  %v3166_v14 = vadd.f32 %v2306_v12, %v532_v8  ;;  %v2096_v15 = vpop.f32.mrb[1].mxu0  ;;  %v2308_v16 = vpop.f32.mrb[1].mxu1 }
 0x200   : > { %v3159_v17 = vadd.f32 %v2096_v15, %v528_v9  ;;  %v3167_v18 = vadd.f32 %v2308_v16, %v536_v10  ;;  %v2098_v19 = vpop.f32.mrb[2].mxu0  ;;  %v2310_v20 = vpop.f32.mrb[2].mxu1 }
 0x201   : > { %v3160_v21 = vadd.f32 %v2098_v19, %v524_v7  ;;  %v3168_v22 = vadd.f32 %v2310_v20, %v532_v8  ;;  %v2100_v23 = vpop.f32.mrb[3].mxu0  ;;  %v2312_v24 = vpop.f32.mrb[3].mxu1  ;;  %v2325_v29 = vmax.f32 %v3158_v13, 0.0  ;;  %v2327_v30 = vmax.f32 %v3166_v14, 0.0 }
 0x202   : > { %v3161_v26 = vadd.f32 %v2100_v23, %v528_v9  ;;  %v3169_v28 = vadd.f32 %v2312_v24, %v536_v10  ;;  %v2326_v33 = vmax.f32 %v3159_v17, 0.0  ;;  %v2328_v34 = vmax.f32 %v3167_v18, 0.0 }
 0x203   : > { %v2329_v31 = vmax.f32 %v3160_v21, 0.0  ;;  %v2331_v32 = vmax.f32 %v3168_v22, 0.0 }
 0x204   : > { %v2330_v27 = vmax.f32 %v3161_v26, 0.0  ;;  %v2332_v35 = vmax.f32 %v3169_v28, 0.0 }
 0x205   : > { %v2341_v37 = vpack.c.bf16 %v2329_v31, %v2325_v29  ;;  %v2343_v25 = vpack.c.bf16 %v2331_v32, %v2327_v30 }
 0x206   : > { %v2342_v36 = vpack.c.bf16 %v2330_v27, %v2326_v33  ;;  %v2344_v38 = vpack.c.bf16 %v2332_v35, %v2328_v34  ;;  %v2104_v39 = vpop.f32.mrb[4].mxu0  ;;  %v2316_v40 = vpop.f32.mrb[4].mxu1 }
 0x207   : > { %v3162_v41 = vadd.f32 %v2104_v39, %v524_v7  ;;  %v3170_v42 = vadd.f32 %v2316_v40, %v532_v8  ;;  %v2106_v43 = vpop.f32.mrb[5].mxu0  ;;  %v2318_v44 = vpop.f32.mrb[5].mxu1 }
 0x208   : > { %v3163_v45 = vadd.f32 %v2106_v43, %v528_v9  ;;  %v3171_v46 = vadd.f32 %v2318_v44, %v536_v10  ;;  %v2108_v47 = vpop.f32.mrb[6].mxu0  ;;  %v2320_v48 = vpop.f32.mrb[6].mxu1  ;;  %2644 = vmatprep.mubr.bf16.mxu0 %v2342_v36  ;;  %2693 = vmatprep.mubr.bf16.mxu1 %v2344_v38 }
 0x209   : > { %v3164_v49 = vadd.f32 %v2108_v47, %v524_v7  ;;  %v3172_v50 = vadd.f32 %v2320_v48, %v532_v8  ;;  %v2110_v51 = vpop.f32.mrb[7].mxu0  ;;  %v2322_v52 = vpop.f32.mrb[7].mxu1  ;;  %2645 = vmatmul.mubr.bf16.vlgmr.msra.gmra.mrb[8].mxu0 %v2341_v37  ;;  %2694 = vmatmul.mubr.bf16.vlgmr.msra.gmra.mrb[8].mxu1 %v2343_v25  ;;  %v2333_v55 = vmax.f32 %v3162_v41, 0.0  ;;  %v2335_v56 = vmax.f32 %v3170_v42, 0.0 }
 0x20a   : > { %v3165_v53 = vadd.f32 %v2110_v51, %v528_v9  ;;  %v3173_v54 = vadd.f32 %v2322_v52, %v536_v10  ;;  %v2334_v59 = vmax.f32 %v3163_v45, 0.0  ;;  %v2336_v60 = vmax.f32 %v3171_v46, 0.0 }
 0x20b   : > { %v2337_v57 = vmax.f32 %v3164_v49, 0.0  ;;  %v2339_v58 = vmax.f32 %v3172_v50, 0.0 }
 0x20c   : > { %v2338_v61 = vmax.f32 %v3165_v53, 0.0  ;;  %v2340_v62 = vmax.f32 %v3173_v54, 0.0 }
 0x20d   : > { %v2345_v63 = vpack.c.bf16 %v2337_v57, %v2333_v55  ;;  %v2347_v0 = vpack.c.bf16 %v2339_v58, %v2335_v56 }
 0x20e   : > { %v2346_v1 = vpack.c.bf16 %v2338_v61, %v2334_v59  ;;  %v2348_v2 = vpack.c.bf16 %v2340_v62, %v2336_v60 }
 0x210   : > { %2652 = vmatprep.mubr.bf16.mxu0 %v2346_v1  ;;  %2701 = vmatprep.mubr.bf16.mxu1 %v2348_v2 }
 0x211   : > { %2653 = vmatmul.mubr.bf16.gmra.mrb[12].mxu0 %v2345_v63  ;;  %2702 = vmatmul.mubr.bf16.gmra.mrb[12].mxu1 %v2347_v0 }
 0x2dc   : > { %v3118_v3 = vpop.f32.mrb[8].mxu0  ;;  %v3146_v4 = vpop.f32.mrb[8].mxu1 }
 0x2dd   : > { %v3119_v6 = vpop.f32.mrb[9].mxu0  ;;  %v3147_v7 = vpop.f32.mrb[9].mxu1 }
 0x2de   : > { %v3120_v8 = vadd.f32 %v3119_v6, %v3118_v3  ;;  %v3148_v9 = vadd.f32 %v3147_v7, %v3146_v4  ;;  %v3121_v10 = vpop.f32.mrb[10].mxu0  ;;  %v3149_v11 = vpop.f32.mrb[10].mxu1 }
 0x2df   : > { %v3122_v12 = vpop.f32.mrb[11].mxu0  ;;  %v3150_v13 = vpop.f32.mrb[11].mxu1 }
 0x2e0   : > { %v2647_v14 = vadd.f32 %v3120_v8, %v3066_v5  ;;  %v3123_v15 = vadd.f32 %v3122_v12, %v3121_v10  ;;  %v3151_v16 = vadd.f32 %v3150_v13, %v3149_v11 }
 0x2e2   : > { %v2696_v17 = vadd.f32 %v3148_v9, %v2647_v14  ;;  %v2650_v18 = vadd.f32 %v3123_v15, %v3066_v5 }
 0x2e4   : > { %2710 = vst [vmem:[%s244_s20] sm:$0xff] %v2696_v17  ;;  %v2699_v19 = vadd.f32 %v3151_v16, %v2650_v18  ;;  %v3124_v20 = vpop.f32.mrb[12].mxu0  ;;  %v3152_v21 = vpop.f32.mrb[12].mxu1 }
 0x2e5   : > { %v3125_v22 = vpop.f32.mrb[13].mxu0  ;;  %v3153_v23 = vpop.f32.mrb[13].mxu1 }
 0x2e6   : > { %2711 = vst [vmem:[%s244_s20 + $0x8] sm:$0xff] %v2699_v19  ;;  %v3126_v24 = vadd.f32 %v3125_v22, %v3124_v20  ;;  %v3154_v26 = vadd.f32 %v3153_v23, %v3152_v21  ;;  %v3127_v28 = vpop.f32.mrb[14].mxu0  ;;  %v3155_v29 = vpop.f32.mrb[14].mxu1 }
 0x2e7   : > { %v3128_v30 = vpop.f32.mrb[15].mxu0  ;;  %v3156_v31 = vpop.f32.mrb[15].mxu1 }
 0x2e8   : > { %v2655_v32 = vadd.f32 %v3126_v24, %v3066_v5  ;;  %v3129_v33 = vadd.f32 %v3128_v30, %v3127_v28  ;;  %v3157_v34 = vadd.f32 %v3156_v31, %v3155_v29 }
 0x2ea   : > { %v2704_v27 = vadd.f32 %v3154_v26, %v2655_v32  ;;  %v2658_v35 = vadd.f32 %v3129_v33, %v3066_v5 }
 0x2ec   : > { %2712 = vst [vmem:[%s244_s20 + $0x10] sm:$0xff] %v2704_v27  ;;  %v2707_v37 = vadd.f32 %v3157_v34, %v2658_v35 }
 0x2ee   : > { %2713 = vst [vmem:[%s244_s20 + $0x18] sm:$0xff] %v2707_v37 }
 0x2ef PF: > { %s16_s18 = sadd.s32 1, %s3697_s18  }
 0x2f0   : > { %p13_p3 = scmp.ge.s32.totalorder %s16_s18, 4  }
 0x2f2   :  { %15 = sbr.rel (!%p13_p3) target bundleno = 1 (0x1), region = 75 }
 0x2f9   :  { %2736 = vsyncpa [#allocation3], 1 }
 0x2fa   :  { %2738 = vsyncpa [#allocation3 + $0x1], 1 }

</bundles_post_ra>
